<compile_context>
chip_gen: v7x
topology: tpu7x:2x2x1
jax: 0.10.0
libtpu: 0.0.40
codegen_flags: <defaults>
</compile_context>

<pallas_src>
import jax
import jax.numpy as jnp
from jax.experimental import pallas as pl
from jax.experimental.pallas import tpu as pltpu

_LANE = 128
_B_ALIGN = 16          # sublane alignment; 16 keeps bf16 (16,128) tiles whole
_MAX_CHUNK = 32        # timesteps per grid step (statically unrolled)
_BN_EPS = 1e-5


def _round_up(x, m):
    return (x + m - 1) // m * m


def _pad_to(a, shape):
    return jnp.pad(a, [(0, s - d) for d, s in zip(a.shape, shape)])


def _tensorcores_per_chip():
    try:
        kind = str(jax.devices()[0].device_kind).lower()
    except Exception:
        return 1
    return 2 if "v7" in kind else 1


def _make_kernel(seq_len, t_chunk, n_chunks):
    def kernel(emb_ref,      # (T_chunk, B_blk, E_pad) bf16 embedded chunk
               w_ih_ref,     # (E_pad, H_pad)  bf16
               w_hh_ref,     # (H_pad, H_pad)  bf16
               b_rnn_ref,    # (1, H_pad)      f32  (b_ih + b_hh)
               w1_ref,       # (H_pad, H2_pad) bf16 (eval-BN folded in)
               b1_ref,       # (1, H2_pad)     f32
               w2_ref,       # (H2_pad, O_pad) bf16
               b2_ref,       # (1, O_pad)      f32
               out_ref,      # (B_blk, O_pad)  f32
               h_scratch,    # VMEM (B_blk, H_pad) f32 persistent hidden state
               pre_scratch): # VMEM (T_chunk, B_blk, H_pad) f32 chunk pre-activations
        c = pl.program_id(1)

        @pl.when(c == 0)
        def _():
            h_scratch[...] = jnp.zeros_like(h_scratch)   # h_0 = 0

        t, b_blk, e_pad = emb_ref.shape
        h_pad = h_scratch.shape[-1]

        # ---- whole-chunk input projection: one big MXU call off the serial
        # chain; bias broadcast once per chunk; result parked in VMEM. -------
        x_all = emb_ref[...].reshape(t * b_blk, e_pad)           # bf16, layout-trivial
        pre = jnp.dot(x_all, w_ih_ref[...],
                      preferred_element_type=jnp.float32) + b_rnn_ref[...]
        pre_scratch[...] = pre.reshape(t, b_blk, h_pad)

        # ---- serial recurrence: only h @ W_hh^T + tanh per timestep --------
        h = h_scratch[...]                                       # f32, lives in vregs
        for j in range(t_chunk):                                 # static unroll
            z = pre_scratch[j] + jnp.dot(h.astype(jnp.bfloat16), w_hh_ref[...],
                                         preferred_element_type=jnp.float32)
            h_new = jnp.tanh(z)
            if (n_chunks - 1) * t_chunk + j >= seq_len:
                # Only trailing padded timesteps of the LAST chunk can be
                # invalid; for those, keep h unchanged.
                valid = (c * t_chunk + j) < seq_len
                h_new = jnp.where(valid, h_new, h)
            h = h_new
        h_scratch[...] = h                                       # one store per chunk

        # NOTE: correct only because the time axis is the innermost grid axis
        # and the output block index is constant across it (block stays
        # VMEM-resident); don't reorder the grid or change the out index_map.
        @pl.when(c == n_chunks - 1)
        def _():
            # fc1 (+ folded eval BatchNorm), Dropout(eval)=identity, fc2
            z1 = jnp.dot(h.astype(jnp.bfloat16), w1_ref[...],
                         preferred_element_type=jnp.float32) + b1_ref[...]
            out_ref[...] = (jnp.dot(z1.astype(jnp.bfloat16), w2_ref[...],
                                    preferred_element_type=jnp.float32)
                            + b2_ref[...])
    return kernel


@jax.jit
def sentiment_forward(text, params):
    """text: (seq_len, batch) int32 token ids. Returns predictions like the torch module."""
    emb_table = params["embedding"]               # (V, E), padding_idx row already zero
    V, E = emb_table.shape
    H = params["w_hh"].shape[0]
    H2 = params["w1"].shape[0]
    O = params["w2"].shape[0]
    S, B = text.shape

    # ---- hardware-friendly padded sizes -------------------------------------
    E_pad = _round_up(E, _LANE)
    H_pad = _round_up(H, _LANE)
    H2_pad = _round_up(H2, _LANE)
    O_pad = _round_up(O, _LANE)

    # Time chunking: pad S up to a multiple of the chunk; tail steps are masked.
    T_chunk = S if S <= _MAX_CHUNK else _MAX_CHUNK
    S_pad = _round_up(S, T_chunk)
    n_chunks = S_pad // T_chunk

    # Batch blocking: >=2 parallel blocks only on v7x (2 TensorCores per chip).
    n_tc = _tensorcores_per_chip()
    B_pad = _round_up(B, _B_ALIGN)
    n_bblk = n_tc if (n_tc > 1 and B_pad >= 2 * _B_ALIGN) else 1
    B_blk = _round_up(-(-B_pad // n_bblk), _B_ALIGN)
    while B_blk > 512:                       # keep per-block embedding DMA modest
        n_bblk *= 2
        B_blk = _round_up(-(-B_pad // n_bblk), _B_ALIGN)
    B_pad = B_blk * n_bblk

    # ---- trace-time gather + weight folding (bf16 streams, f32 biases) ------
    # Pad the TABLE (not the activations): the gather emits already-padded bf16
    # rows, so no extra full-tensor pad/cast passes through HBM.
    # TODO(synk): move the gather in-kernel (scalar-prefetched ids + HBM table
    #             DMA) to avoid materializing the (S, B, E_pad) stream at all.
    table_p = _pad_to(emb_table, (V, E_pad)).astype(jnp.bfloat16)
    text_p = jnp.pad(text, ((0, S_pad - S), (0, B_pad - B)))      # pad with token 0
    embedded = jnp.take(table_p, text_p, axis=0)                  # (S_pad, B_pad, E_pad) bf16

    w_ih_t = _pad_to(params["w_ih"].T, (E_pad, H_pad)).astype(jnp.bfloat16)
    w_hh_t = _pad_to(params["w_hh"].T, (H_pad, H_pad)).astype(jnp.bfloat16)
    b_rnn = _pad_to((params["b_ih"] + params["b_hh"]).reshape(1, H), (1, H_pad))

    # Fold eval-mode BatchNorm1d into fc1.
    scale = params["bn_gamma"] * jax.lax.rsqrt(params["bn_var"] + _BN_EPS)     # (H2,)
    w1_eff = params["w1"].T * scale[None, :]                                    # (H, H2)
    b1_eff = (params["b1"] - params["bn_mean"]) * scale + params["bn_beta"]     # (H2,)
    w1_eff = _pad_to(w1_eff, (H_pad, H2_pad)).astype(jnp.bfloat16)
    b1_eff = _pad_to(b1_eff.reshape(1, H2), (1, H2_pad))

    w2_t = _pad_to(params["w2"].T, (H2_pad, O_pad)).astype(jnp.bfloat16)
    b2 = _pad_to(params["b2"].reshape(1, O), (1, O_pad))

    # ---- grid / specs --------------------------------------------------------
    grid = (B_pad // B_blk, n_chunks)       # (parallel over batch, arbitrary over time)
    in_specs = [
        pl.BlockSpec((T_chunk, B_blk, E_pad), lambda b, c: (c, b, 0)),
        pl.BlockSpec((E_pad, H_pad), lambda b, c: (0, 0)),
        pl.BlockSpec((H_pad, H_pad), lambda b, c: (0, 0)),
        pl.BlockSpec((1, H_pad), lambda b, c: (0, 0)),
        pl.BlockSpec((H_pad, H2_pad), lambda b, c: (0, 0)),
        pl.BlockSpec((1, H2_pad), lambda b, c: (0, 0)),
        pl.BlockSpec((H2_pad, O_pad), lambda b, c: (0, 0)),
        pl.BlockSpec((1, O_pad), lambda b, c: (0, 0)),
    ]
    out_spec = pl.BlockSpec((B_blk, O_pad), lambda b, c: (b, 0))

    # Explicit VMEM budget; Pallas double-buffers EVERY input block.
    bf16, f32 = 2, 4
    vmem_need = (
        2 * T_chunk * B_blk * E_pad * bf16                           # embedding chunks
        + 2 * (E_pad * H_pad + H_pad * H_pad
               + H_pad * H2_pad + H2_pad * O_pad) * bf16             # weights
        + 2 * (H_pad + H2_pad + O_pad) * f32                         # biases
        + 2 * B_blk * O_pad * f32                                    # output
        + (B_blk * H_pad + T_chunk * B_blk * H_pad) * f32            # scratch
    )
    vmem_limit = int(min(max(2 * vmem_need, 4 << 20), 32 << 20))

    out = pl.pallas_call(
        _make_kernel(S, T_chunk, n_chunks),
        out_shape=jax.ShapeDtypeStruct((B_pad, O_pad), jnp.float32),
        grid_spec=pltpu.PrefetchScalarGridSpec(
            num_scalar_prefetch=0,
            grid=grid,
            in_specs=in_specs,
            out_specs=out_spec,
            scratch_shapes=[pltpu.VMEM((B_blk, H_pad), jnp.float32),
                            pltpu.VMEM((T_chunk, B_blk, H_pad), jnp.float32)],
        ),
        compiler_params=pltpu.CompilerParams(
            dimension_semantics=("parallel", "arbitrary"),
            vmem_limit_bytes=vmem_limit,
        ),
    )(embedded, w_ih_t, w_hh_t, b_rnn, w1_eff, b1_eff, w2_t, b2)

    # torch: predictions = fc(hidden.squeeze()).squeeze()
    return jnp.squeeze(out[:B, :O])


def init_params(key, vocab_size, emb_dim, hidden_dim, output_dim, pad_idx):
    keys = jax.random.split(key, 10)
    h2 = hidden_dim // 2
    s_rnn = 1.0 / jnp.sqrt(hidden_dim)
    s_fc1 = 1.0 / jnp.sqrt(hidden_dim)
    s_fc2 = 1.0 / jnp.sqrt(h2)

    emb = jax.random.normal(keys[0], (vocab_size, emb_dim), jnp.float32)
    emb = emb.at[pad_idx].set(0.0)                       # nn.Embedding padding_idx row = 0

    return {
        "embedding": emb,
        "w_ih": jax.random.uniform(keys[1], (hidden_dim, emb_dim), jnp.float32, -s_rnn, s_rnn),
        "w_hh": jax.random.uniform(keys[2], (hidden_dim, hidden_dim), jnp.float32, -s_rnn, s_rnn),
        "b_ih": jax.random.uniform(keys[3], (hidden_dim,), jnp.float32, -s_rnn, s_rnn),
        "b_hh": jax.random.uniform(keys[4], (hidden_dim,), jnp.float32, -s_rnn, s_rnn),
        "w1": jax.random.uniform(keys[5], (h2, hidden_dim), jnp.float32, -s_fc1, s_fc1),
        "b1": jax.random.uniform(keys[6], (h2,), jnp.float32, -s_fc1, s_fc1),
        "bn_gamma": jnp.ones((h2,), jnp.float32),
        "bn_beta": jnp.zeros((h2,), jnp.float32),
        "bn_mean": jnp.zeros((h2,), jnp.float32),
        "bn_var": jnp.ones((h2,), jnp.float32),
        "w2": jax.random.uniform(keys[7], (output_dim, h2), jnp.float32, -s_fc2, s_fc2),
        "b2": jax.random.uniform(keys[8], (output_dim,), jnp.float32, -s_fc2, s_fc2),
    }


if __name__ == "__main__":
    vocab_size, emb_dim, hidden_dim, output_dim, pad_idx = 50, 32, 32, 1, 0
    seq_len, batch = 8, 4

    key = jax.random.PRNGKey(0)
    k_param, k_text = jax.random.split(key)
    params = init_params(k_param, vocab_size, emb_dim, hidden_dim, output_dim, pad_idx)

    # (seq_len, batch) token ids, some padding tokens included
    text = jax.random.randint(k_text, (seq_len, batch), 0, vocab_size, dtype=jnp.int32)

    preds = sentiment_forward(text, params)
    jax.block_until_ready(preds)

    assert preds.shape == (batch,), preds.shape
    assert jnp.all(jnp.isfinite(preds))
    print("KERNEL_OK")
</pallas_src>

<mosaic_0001>
module attributes {stable_mosaic.version = 11 : i64} {
  func.func @kernel(%arg0: i32, %arg1: i32, %arg2: memref<8x16x128xbf16, #tpu.memory_space<vmem>>, %arg3: memref<128x128xbf16, #tpu.memory_space<vmem>>, %arg4: memref<128x128xbf16, #tpu.memory_space<vmem>>, %arg5: memref<1x128xf32, #tpu.memory_space<vmem>>, %arg6: memref<128x128xbf16, #tpu.memory_space<vmem>>, %arg7: memref<1x128xf32, #tpu.memory_space<vmem>>, %arg8: memref<128x128xbf16, #tpu.memory_space<vmem>>, %arg9: memref<1x128xf32, #tpu.memory_space<vmem>>, %arg10: memref<16x128xf32, #tpu.memory_space<vmem>>, %arg11: memref<16x128xf32, #tpu.memory_space<vmem>>, %arg12: memref<8x16x128xf32, #tpu.memory_space<vmem>>) attributes {dimension_semantics = [#tpu.dimension_semantics<parallel>, #tpu.dimension_semantics<arbitrary>], iteration_bounds = array<i64: 1, 1>, scalar_prefetch = 0 : i64, scratch_operands = 2 : i64, tpu.core_type = #tpu.core_type<tc>, window_params = [{transform_indices = @transform_0, window_bounds = array<i64: 8, 16, 128>}, {pipeline_mode = #tpu.pipeline_mode<synchronous>, transform_indices = @transform_1, window_bounds = array<i64: 128, 128>}, {pipeline_mode = #tpu.pipeline_mode<synchronous>, transform_indices = @transform_2, window_bounds = array<i64: 128, 128>}, {pipeline_mode = #tpu.pipeline_mode<synchronous>, transform_indices = @transform_3, window_bounds = array<i64: 1, 128>}, {pipeline_mode = #tpu.pipeline_mode<synchronous>, transform_indices = @transform_4, window_bounds = array<i64: 128, 128>}, {pipeline_mode = #tpu.pipeline_mode<synchronous>, transform_indices = @transform_5, window_bounds = array<i64: 1, 128>}, {pipeline_mode = #tpu.pipeline_mode<synchronous>, transform_indices = @transform_6, window_bounds = array<i64: 128, 128>}, {pipeline_mode = #tpu.pipeline_mode<synchronous>, transform_indices = @transform_7, window_bounds = array<i64: 1, 128>}, {transform_indices = @transform_8, window_bounds = array<i64: 16, 128>}]} {
    %c0_i32 = arith.constant 0 : i32
    %0 = arith.cmpi eq, %arg1, %c0_i32 : i32
    %1 = arith.extui %0 : i1 to i32
    %c0_i32_0 = arith.constant 0 : i32
    %2 = arith.cmpi ne, %1, %c0_i32_0 : i32
    scf.if %2 {
      %cst_57 = arith.constant 0.000000e+00 : f32
      %73 = vector.broadcast %cst_57 : f32 to vector<16x128xf32>
      %c0_58 = arith.constant 0 : index
      %c0_59 = arith.constant 0 : index
      %74 = vector.load %arg11[%c0_58, %c0_59] : memref<16x128xf32, #tpu.memory_space<vmem>>, vector<16x128xf32>
      tpu.vector_store %arg11[%c0_58, %c0_59], %73 {strides = array<i32>} : memref<16x128xf32, #tpu.memory_space<vmem>>, vector<16x128xf32>,
    } else {
    }
    %c0 = arith.constant 0 : index
    %c0_1 = arith.constant 0 : index
    %c0_2 = arith.constant 0 : index
    %3 = vector.load %arg2[%c0, %c0_1, %c0_2] : memref<8x16x128xbf16, #tpu.memory_space<vmem>>, vector<8x16x128xbf16>
    %4 = vector.shape_cast %3 : vector<8x16x128xbf16> to vector<128x128xbf16>
    %c0_3 = arith.constant 0 : index
    %c0_4 = arith.constant 0 : index
    %5 = vector.load %arg3[%c0_3, %c0_4] : memref<128x128xbf16, #tpu.memory_space<vmem>>, vector<128x128xbf16>
    %cst = arith.constant dense<0.000000e+00> : vector<128x128xf32>
    %6 = tpu.matmul %4, %5, %cst {dimension_numbers = #tpu.dot_dimension_numbers<[1], [0], [0], [1], [0, 0, 1, 1], [], []>} : vector<128x128xbf16>, vector<128x128xbf16>, vector<128x128xf32> -> vector<128x128xf32>
    %c0_5 = arith.constant 0 : index
    %c0_6 = arith.constant 0 : index
    %7 = vector.load %arg5[%c0_5, %c0_6] : memref<1x128xf32, #tpu.memory_space<vmem>>, vector<1x128xf32>
    %8 = vector.broadcast %7 : vector<1x128xf32> to vector<128x128xf32>
    %9 = arith.addf %6, %8 : vector<128x128xf32>
    %10 = vector.shape_cast %9 : vector<128x128xf32> to vector<8x16x128xf32>
    %c0_7 = arith.constant 0 : index
    %c0_8 = arith.constant 0 : index
    %c0_9 = arith.constant 0 : index
    %11 = vector.load %arg12[%c0_7, %c0_8, %c0_9] : memref<8x16x128xf32, #tpu.memory_space<vmem>>, vector<8x16x128xf32>
    tpu.vector_store %arg12[%c0_7, %c0_8, %c0_9], %10 {strides = array<i32>} : memref<8x16x128xf32, #tpu.memory_space<vmem>>, vector<8x16x128xf32>,
    %c0_10 = arith.constant 0 : index
    %c0_11 = arith.constant 0 : index
    %12 = vector.load %arg11[%c0_10, %c0_11] : memref<16x128xf32, #tpu.memory_space<vmem>>, vector<16x128xf32>
    %c0_12 = arith.constant 0 : index
    %c0_13 = arith.constant 0 : index
    %c0_14 = arith.constant 0 : index
    %13 = vector.load %arg12[%c0_12, %c0_13, %c0_14] : memref<8x16x128xf32, #tpu.memory_space<vmem>>, vector<1x16x128xf32>
    %14 = vector.shape_cast %13 : vector<1x16x128xf32> to vector<16x128xf32>
    %15 = arith.truncf %12 : vector<16x128xf32> to vector<16x128xbf16>
    %c0_15 = arith.constant 0 : index
    %c0_16 = arith.constant 0 : index
    %16 = vector.load %arg4[%c0_15, %c0_16] : memref<128x128xbf16, #tpu.memory_space<vmem>>, vector<128x128xbf16>
    %cst_17 = arith.constant dense<0.000000e+00> : vector<16x128xf32>
    %17 = tpu.matmul %15, %16, %cst_17 {dimension_numbers = #tpu.dot_dimension_numbers<[1], [0], [0], [1], [0, 0, 1, 1], [], []>} : vector<16x128xbf16>, vector<128x128xbf16>, vector<16x128xf32> -> vector<16x128xf32>
    %18 = arith.addf %14, %17 : vector<16x128xf32>
    %19 = math.tanh %18 : vector<16x128xf32>
    %c1 = arith.constant 1 : index
    %c0_18 = arith.constant 0 : index
    %c0_19 = arith.constant 0 : index
    %20 = vector.load %arg12[%c1, %c0_18, %c0_19] : memref<8x16x128xf32, #tpu.memory_space<vmem>>, vector<1x16x128xf32>
    %21 = vector.shape_cast %20 : vector<1x16x128xf32> to vector<16x128xf32>
    %22 = arith.truncf %19 : vector<16x128xf32> to vector<16x128xbf16>
    %c0_20 = arith.constant 0 : index
    %c0_21 = arith.constant 0 : index
    %23 = vector.load %arg4[%c0_20, %c0_21] : memref<128x128xbf16, #tpu.memory_space<vmem>>, vector<128x128xbf16>
    %cst_22 = arith.constant dense<0.000000e+00> : vector<16x128xf32>
    %24 = tpu.matmul %22, %23, %cst_22 {dimension_numbers = #tpu.dot_dimension_numbers<[1], [0], [0], [1], [0, 0, 1, 1], [], []>} : vector<16x128xbf16>, vector<128x128xbf16>, vector<16x128xf32> -> vector<16x128xf32>
    %25 = arith.addf %21, %24 : vector<16x128xf32>
    %26 = math.tanh %25 : vector<16x128xf32>
    %c2 = arith.constant 2 : index
    %c0_23 = arith.constant 0 : index
    %c0_24 = arith.constant 0 : index
    %27 = vector.load %arg12[%c2, %c0_23, %c0_24] : memref<8x16x128xf32, #tpu.memory_space<vmem>>, vector<1x16x128xf32>
    %28 = vector.shape_cast %27 : vector<1x16x128xf32> to vector<16x128xf32>
    %29 = arith.truncf %26 : vector<16x128xf32> to vector<16x128xbf16>
    %c0_25 = arith.constant 0 : index
    %c0_26 = arith.constant 0 : index
    %30 = vector.load %arg4[%c0_25, %c0_26] : memref<128x128xbf16, #tpu.memory_space<vmem>>, vector<128x128xbf16>
    %cst_27 = arith.constant dense<0.000000e+00> : vector<16x128xf32>
    %31 = tpu.matmul %29, %30, %cst_27 {dimension_numbers = #tpu.dot_dimension_numbers<[1], [0], [0], [1], [0, 0, 1, 1], [], []>} : vector<16x128xbf16>, vector<128x128xbf16>, vector<16x128xf32> -> vector<16x128xf32>
    %32 = arith.addf %28, %31 : vector<16x128xf32>
    %33 = math.tanh %32 : vector<16x128xf32>
    %c3 = arith.constant 3 : index
    %c0_28 = arith.constant 0 : index
    %c0_29 = arith.constant 0 : index
    %34 = vector.load %arg12[%c3, %c0_28, %c0_29] : memref<8x16x128xf32, #tpu.memory_space<vmem>>, vector<1x16x128xf32>
    %35 = vector.shape_cast %34 : vector<1x16x128xf32> to vector<16x128xf32>
    %36 = arith.truncf %33 : vector<16x128xf32> to vector<16x128xbf16>
    %c0_30 = arith.constant 0 : index
    %c0_31 = arith.constant 0 : index
    %37 = vector.load %arg4[%c0_30, %c0_31] : memref<128x128xbf16, #tpu.memory_space<vmem>>, vector<128x128xbf16>
    %cst_32 = arith.constant dense<0.000000e+00> : vector<16x128xf32>
    %38 = tpu.matmul %36, %37, %cst_32 {dimension_numbers = #tpu.dot_dimension_numbers<[1], [0], [0], [1], [0, 0, 1, 1], [], []>} : vector<16x128xbf16>, vector<128x128xbf16>, vector<16x128xf32> -> vector<16x128xf32>
    %39 = arith.addf %35, %38 : vector<16x128xf32>
    %40 = math.tanh %39 : vector<16x128xf32>
    %c4 = arith.constant 4 : index
    %c0_33 = arith.constant 0 : index
    %c0_34 = arith.constant 0 : index
    %41 = vector.load %arg12[%c4, %c0_33, %c0_34] : memref<8x16x128xf32, #tpu.memory_space<vmem>>, vector<1x16x128xf32>
    %42 = vector.shape_cast %41 : vector<1x16x128xf32> to vector<16x128xf32>
    %43 = arith.truncf %40 : vector<16x128xf32> to vector<16x128xbf16>
    %c0_35 = arith.constant 0 : index
    %c0_36 = arith.constant 0 : index
    %44 = vector.load %arg4[%c0_35, %c0_36] : memref<128x128xbf16, #tpu.memory_space<vmem>>, vector<128x128xbf16>
    %cst_37 = arith.constant dense<0.000000e+00> : vector<16x128xf32>
    %45 = tpu.matmul %43, %44, %cst_37 {dimension_numbers = #tpu.dot_dimension_numbers<[1], [0], [0], [1], [0, 0, 1, 1], [], []>} : vector<16x128xbf16>, vector<128x128xbf16>, vector<16x128xf32> -> vector<16x128xf32>
    %46 = arith.addf %42, %45 : vector<16x128xf32>
    %47 = math.tanh %46 : vector<16x128xf32>
    %c5 = arith.constant 5 : index
    %c0_38 = arith.constant 0 : index
    %c0_39 = arith.constant 0 : index
    %48 = vector.load %arg12[%c5, %c0_38, %c0_39] : memref<8x16x128xf32, #tpu.memory_space<vmem>>, vector<1x16x128xf32>
    %49 = vector.shape_cast %48 : vector<1x16x128xf32> to vector<16x128xf32>
    %50 = arith.truncf %47 : vector<16x128xf32> to vector<16x128xbf16>
    %c0_40 = arith.constant 0 : index
    %c0_41 = arith.constant 0 : index
    %51 = vector.load %arg4[%c0_40, %c0_41] : memref<128x128xbf16, #tpu.memory_space<vmem>>, vector<128x128xbf16>
    %cst_42 = arith.constant dense<0.000000e+00> : vector<16x128xf32>
    %52 = tpu.matmul %50, %51, %cst_42 {dimension_numbers = #tpu.dot_dimension_numbers<[1], [0], [0], [1], [0, 0, 1, 1], [], []>} : vector<16x128xbf16>, vector<128x128xbf16>, vector<16x128xf32> -> vector<16x128xf32>
    %53 = arith.addf %49, %52 : vector<16x128xf32>
    %54 = math.tanh %53 : vector<16x128xf32>
    %c6 = arith.constant 6 : index
    %c0_43 = arith.constant 0 : index
    %c0_44 = arith.constant 0 : index
    %55 = vector.load %arg12[%c6, %c0_43, %c0_44] : memref<8x16x128xf32, #tpu.memory_space<vmem>>, vector<1x16x128xf32>
    %56 = vector.shape_cast %55 : vector<1x16x128xf32> to vector<16x128xf32>
    %57 = arith.truncf %54 : vector<16x128xf32> to vector<16x128xbf16>
    %c0_45 = arith.constant 0 : index
    %c0_46 = arith.constant 0 : index
    %58 = vector.load %arg4[%c0_45, %c0_46] : memref<128x128xbf16, #tpu.memory_space<vmem>>, vector<128x128xbf16>
    %cst_47 = arith.constant dense<0.000000e+00> : vector<16x128xf32>
    %59 = tpu.matmul %57, %58, %cst_47 {dimension_numbers = #tpu.dot_dimension_numbers<[1], [0], [0], [1], [0, 0, 1, 1], [], []>} : vector<16x128xbf16>, vector<128x128xbf16>, vector<16x128xf32> -> vector<16x128xf32>
    %60 = arith.addf %56, %59 : vector<16x128xf32>
    %61 = math.tanh %60 : vector<16x128xf32>
    %c7 = arith.constant 7 : index
    %c0_48 = arith.constant 0 : index
    %c0_49 = arith.constant 0 : index
    %62 = vector.load %arg12[%c7, %c0_48, %c0_49] : memref<8x16x128xf32, #tpu.memory_space<vmem>>, vector<1x16x128xf32>
    %63 = vector.shape_cast %62 : vector<1x16x128xf32> to vector<16x128xf32>
    %64 = arith.truncf %61 : vector<16x128xf32> to vector<16x128xbf16>
    %c0_50 = arith.constant 0 : index
    %c0_51 = arith.constant 0 : index
    %65 = vector.load %arg4[%c0_50, %c0_51] : memref<128x128xbf16, #tpu.memory_space<vmem>>, vector<128x128xbf16>
    %cst_52 = arith.constant dense<0.000000e+00> : vector<16x128xf32>
    %66 = tpu.matmul %64, %65, %cst_52 {dimension_numbers = #tpu.dot_dimension_numbers<[1], [0], [0], [1], [0, 0, 1, 1], [], []>} : vector<16x128xbf16>, vector<128x128xbf16>, vector<16x128xf32> -> vector<16x128xf32>
    %67 = arith.addf %63, %66 : vector<16x128xf32>
    %68 = math.tanh %67 : vector<16x128xf32>
    %c0_53 = arith.constant 0 : index
    %c0_54 = arith.constant 0 : index
    %69 = vector.load %arg11[%c0_53, %c0_54] : memref<16x128xf32, #tpu.memory_space<vmem>>, vector<16x128xf32>
    tpu.vector_store %arg11[%c0_53, %c0_54], %68 {strides = array<i32>} : memref<16x128xf32, #tpu.memory_space<vmem>>, vector<16x128xf32>,
    %c0_i32_55 = arith.constant 0 : i32
    %70 = arith.cmpi eq, %arg1, %c0_i32_55 : i32
    %71 = arith.extui %70 : i1 to i32
    %c0_i32_56 = arith.constant 0 : i32
    %72 = arith.cmpi ne, %71, %c0_i32_56 : i32
    scf.if %72 {
      %73 = arith.truncf %68 : vector<16x128xf32> to vector<16x128xbf16>
      %c0_57 = arith.constant 0 : index
      %c0_58 = arith.constant 0 : index
      %74 = vector.load %arg6[%c0_57, %c0_58] : memref<128x128xbf16, #tpu.memory_space<vmem>>, vector<128x128xbf16>
      %cst_59 = arith.constant dense<0.000000e+00> : vector<16x128xf32>
      %75 = tpu.matmul %73, %74, %cst_59 {dimension_numbers = #tpu.dot_dimension_numbers<[1], [0], [0], [1], [0, 0, 1, 1], [], []>} : vector<16x128xbf16>, vector<128x128xbf16>, vector<16x128xf32> -> vector<16x128xf32>
      %c0_60 = arith.constant 0 : index
      %c0_61 = arith.constant 0 : index
      %76 = vector.load %arg7[%c0_60, %c0_61] : memref<1x128xf32, #tpu.memory_space<vmem>>, vector<1x128xf32>
      %77 = vector.broadcast %76 : vector<1x128xf32> to vector<16x128xf32>
      %78 = arith.addf %75, %77 : vector<16x128xf32>
      %79 = arith.truncf %78 : vector<16x128xf32> to vector<16x128xbf16>
      %c0_62 = arith.constant 0 : index
      %c0_63 = arith.constant 0 : index
      %80 = vector.load %arg8[%c0_62, %c0_63] : memref<128x128xbf16, #tpu.memory_space<vmem>>, vector<128x128xbf16>
      %cst_64 = arith.constant dense<0.000000e+00> : vector<16x128xf32>
      %81 = tpu.matmul %79, %80, %cst_64 {dimension_numbers = #tpu.dot_dimension_numbers<[1], [0], [0], [1], [0, 0, 1, 1], [], []>} : vector<16x128xbf16>, vector<128x128xbf16>, vector<16x128xf32> -> vector<16x128xf32>
      %c0_65 = arith.constant 0 : index
      %c0_66 = arith.constant 0 : index
      %82 = vector.load %arg9[%c0_65, %c0_66] : memref<1x128xf32, #tpu.memory_space<vmem>>, vector<1x128xf32>
      %83 = vector.broadcast %82 : vector<1x128xf32> to vector<16x128xf32>
      %84 = arith.addf %81, %83 : vector<16x128xf32>
      %c0_67 = arith.constant 0 : index
      %c0_68 = arith.constant 0 : index
      %85 = vector.load %arg10[%c0_67, %c0_68] : memref<16x128xf32, #tpu.memory_space<vmem>>, vector<16x128xf32>
      tpu.vector_store %arg10[%c0_67, %c0_68], %84 {strides = array<i32>} : memref<16x128xf32, #tpu.memory_space<vmem>>, vector<16x128xf32>,
    } else {
    }
    return
  }
  func.func @transform_0(%arg0: i32, %arg1: i32) -> (i32, i32, i32) {
    %c0_i32 = arith.constant 0 : i32
    %c0_i32_0 = arith.constant 0 : i32
    return %arg1, %arg0, %c0_i32 : i32, i32, i32
  }
  func.func @transform_1(%arg0: i32, %arg1: i32) -> (i32, i32) {
    %c0_i32 = arith.constant 0 : i32
    %c0_i32_0 = arith.constant 0 : i32
    %c0_i32_1 = arith.constant 0 : i32
    return %c0_i32, %c0_i32_0 : i32, i32
  }
  func.func @transform_2(%arg0: i32, %arg1: i32) -> (i32, i32) {
    %c0_i32 = arith.constant 0 : i32
    %c0_i32_0 = arith.constant 0 : i32
    %c0_i32_1 = arith.constant 0 : i32
    return %c0_i32, %c0_i32_0 : i32, i32
  }
  func.func @transform_3(%arg0: i32, %arg1: i32) -> (i32, i32) {
    %c0_i32 = arith.constant 0 : i32
    %c0_i32_0 = arith.constant 0 : i32
    %c0_i32_1 = arith.constant 0 : i32
    return %c0_i32, %c0_i32_0 : i32, i32
  }
  func.func @transform_4(%arg0: i32, %arg1: i32) -> (i32, i32) {
    %c0_i32 = arith.constant 0 : i32
    %c0_i32_0 = arith.constant 0 : i32
    %c0_i32_1 = arith.constant 0 : i32
    return %c0_i32, %c0_i32_0 : i32, i32
  }
  func.func @transform_5(%arg0: i32, %arg1: i32) -> (i32, i32) {
    %c0_i32 = arith.constant 0 : i32
    %c0_i32_0 = arith.constant 0 : i32
    %c0_i32_1 = arith.constant 0 : i32
    return %c0_i32, %c0_i32_0 : i32, i32
  }
  func.func @transform_6(%arg0: i32, %arg1: i32) -> (i32, i32) {
    %c0_i32 = arith.constant 0 : i32
    %c0_i32_0 = arith.constant 0 : i32
    %c0_i32_1 = arith.constant 0 : i32
    return %c0_i32, %c0_i32_0 : i32, i32
  }
  func.func @transform_7(%arg0: i32, %arg1: i32) -> (i32, i32) {
    %c0_i32 = arith.constant 0 : i32
    %c0_i32_0 = arith.constant 0 : i32
    %c0_i32_1 = arith.constant 0 : i32
    return %c0_i32, %c0_i32_0 : i32, i32
  }
  func.func @transform_8(%arg0: i32, %arg1: i32) -> (i32, i32) {
    %c0_i32 = arith.constant 0 : i32
    %c0_i32_0 = arith.constant 0 : i32
    return %arg0, %c0_i32 : i32, i32
  }
}

</mosaic_0001>

<bundles_post_ra>
// kernel: sentiment_forward.1
= control target key start
LH: loop header
LB: loop body
LE: loop exit
PB: predicated region body
PF: predicated region fallthrough
CT: control target
= control target key end

     0   :  { %v1434_v1 = vmov 0.0   ;;  %vm1435_vm0 = vmmov 0   ;;  %v1436_v20 = vmov 0.0|0.0   ;;  %s1851_s1 = inlined_call_operand.vmem [shape: bf16[128,128], index: 1, kind: input, shape index: {}]   ;;  %s1852_s2 = inlined_call_operand.vmem [shape: bf16[128,128], index: 2, kind: input, shape index: {}]   ;;  %s1853_s0 = inlined_call_operand.vmem [shape: bf16[8,16,128], index: 0, kind: input, shape index: {}]   ;;  %s1854_s3 = inlined_call_operand.vmem [shape: f32[1,128], index: 3, kind: input, shape index: {}]   ;;  %s1855_s4 = inlined_call_operand.vmem [shape: bf16[128,128], index: 4, kind: input, shape index: {}]   ;;  %s1856_s6 = inlined_call_operand.vmem [shape: bf16[128,128], index: 6, kind: input, shape index: {}]   ;;  %s1857_s5 = inlined_call_operand.vmem [shape: f32[1,128], index: 5, kind: input, shape index: {}]   ;;  %s1858_s7 = inlined_call_operand.vmem [shape: f32[1,128], index: 7, kind: input, shape index: {}]   ;;  %s1859_s8 = inlined_call_operand.vmem [shape: f32[16,128], index: 8, kind: output, shape index: {}]  }
   0x1   :  { %v1362_v0 = vld [vmem:[%s1851_s1] sm:$0xff]   ;;  %1159 = vmatprep.subr.bf16.mxu1 %v1434_v1  ;;  %1175 = vmatprep.mubr.msk.bf16.mxu1 %vm1435_vm0, %v1434_v1  ;;  %v1364_v3 = vld [vmem:[%s1851_s1 + $0x8] sm:$0xff]   ;;  %v1366_v5 = vld [vmem:[%s1851_s1 + $0x10] sm:$0xff]  }
   0x2   :  { %v1491_v2 = vld [vmem:[%s1852_s2] sm:$0xff]   ;;  %1127 = vmatprep.subr.bf16.mxu0 %v1362_v0  ;;  %v1500_v4 = vld [vmem:[%s1852_s2 + $0x8] sm:$0xff]   ;;  %v1510_v6 = vld [vmem:[%s1852_s2 + $0x10] sm:$0xff]  }
   0x3   :  { %1128 = vmatpush3.bf16.msra.mxu0 %v1362_v0  ;;  %1160 = vmatpush3.bf16.msra.mxu1 %v1491_v2  ;;  %v1368_v7 = vld [vmem:[%s1851_s1 + $0x18] sm:$0xff]   ;;  %v1370_v9 = vld [vmem:[%s1851_s1 + $0x20] sm:$0xff]   ;;  %v1372_v11 = vld [vmem:[%s1851_s1 + $0x28] sm:$0xff]  }
   0x4   :  { %1129 = vmatprep.subr.bf16.mxu0 %v1364_v3  ;;  %1161 = vmatprep.subr.bf16.mxu1 %v1434_v1  ;;  %v1520_v8 = vld [vmem:[%s1852_s2 + $0x18] sm:$0xff]   ;;  %v1529_v10 = vld [vmem:[%s1852_s2 + $0x20] sm:$0xff]   ;;  %v1542_v13 = vld [vmem:[%s1852_s2 + $0x28] sm:$0xff]  }
   0x5   :  { %v1378_v12 = vld [vmem:[%s1853_s0] sm:$0xff]   ;;  %v1374_v14 = vld [vmem:[%s1851_s1 + $0x30] sm:$0xff]   ;;  %v1376_v16 = vld [vmem:[%s1851_s1 + $0x38] sm:$0xff]  }
   0x6   :  { %1143 = vmatprep.mubr.bf16.mxu0 %v1378_v12  ;;  %v1553_v15 = vld [vmem:[%s1852_s2 + $0x30] sm:$0xff]   ;;  %v1563_v17 = vld [vmem:[%s1852_s2 + $0x38] sm:$0xff]   ;;  %v1379_v18 = vld [vmem:[%s1853_s0 + $0x8] sm:$0xff]  }
   0x7   :  { %1130 = vmatpush3.bf16.msra.mxu0 %v1364_v3  ;;  %1162 = vmatpush3.bf16.msra.mxu1 %v1500_v4  ;;  %v1380_v19 = vld [vmem:[%s1853_s0 + $0x10] sm:$0xff]   ;;  %v1381_v21 = vld [vmem:[%s1853_s0 + $0x18] sm:$0xff]   ;;  %v1382_v22 = vld [vmem:[%s1853_s0 + $0x20] sm:$0xff]  }
   0x8   :  { %1131 = vmatprep.subr.bf16.mxu0 %v1366_v5  ;;  %1163 = vmatprep.subr.bf16.mxu1 %v1434_v1  ;;  %v1383_v23 = vld [vmem:[%s1853_s0 + $0x28] sm:$0xff]   ;;  %v1384_v24 = vld [vmem:[%s1853_s0 + $0x30] sm:$0xff]   ;;  %v1385_v25 = vld [vmem:[%s1853_s0 + $0x38] sm:$0xff]  }
   0x9   :  { %v1629_v26 = vld [vmem:[%s1854_s3] ss:$0 sm:$0xff] }
   0xb   :  { %1132 = vmatpush3.bf16.msra.mxu0 %v1366_v5  ;;  %1164 = vmatpush3.bf16.msra.mxu1 %v1510_v6 }
   0xc   :  { %1133 = vmatprep.subr.bf16.mxu0 %v1368_v7  ;;  %1165 = vmatprep.subr.bf16.mxu1 %v1434_v1 }
   0xf   :  { %1134 = vmatpush3.bf16.msra.mxu0 %v1368_v7  ;;  %1166 = vmatpush3.bf16.msra.mxu1 %v1520_v8 }
  0x10   :  { %1135 = vmatprep.subr.bf16.mxu0 %v1370_v9  ;;  %1167 = vmatprep.subr.bf16.mxu1 %v1434_v1 }
  0x13   :  { %1136 = vmatpush3.bf16.msra.mxu0 %v1370_v9  ;;  %1168 = vmatpush3.bf16.msra.mxu1 %v1529_v10 }
  0x14   :  { %1137 = vmatprep.subr.bf16.mxu0 %v1372_v11  ;;  %1169 = vmatprep.subr.bf16.mxu1 %v1434_v1 }
  0x17   :  { %1138 = vmatpush3.bf16.msra.mxu0 %v1372_v11  ;;  %1170 = vmatpush3.bf16.msra.mxu1 %v1542_v13 }
  0x18   :  { %1139 = vmatprep.subr.bf16.mxu0 %v1374_v14  ;;  %1171 = vmatprep.subr.bf16.mxu1 %v1434_v1 }
  0x1b   :  { %1140 = vmatpush3.bf16.msra.mxu0 %v1374_v14  ;;  %1172 = vmatpush3.bf16.msra.mxu1 %v1553_v15 }
  0x1c   :  { %1141 = vmatprep.subr.bf16.mxu0 %v1376_v16  ;;  %1173 = vmatprep.subr.bf16.mxu1 %v1434_v1 }
  0x1f   :  { %1142 = vmatpush3.bf16.msra.mxu0 %v1376_v16  ;;  %1174 = vmatpush3.bf16.msra.mxu1 %v1563_v17 }
  0x20   :  { %1179 = vmatprep.subr.bf16.mxu0 %v1434_v1  ;;  %1199 = vmatprep.subr.bf16.mxu1 %v1434_v1 }
  0x22   :  { %1144 = vmatmul.mubr.bf16.vlgmr.msra.gmra.mrb[0].mxu0 %v1379_v18  ;;  %1176 = vmatmul.mubr.bf16.vlgmr.msra.gmra.mrb[0].mxu1 %v1436_v20 }
  0x23   :  { %1180 = vmatpush3.bf16.msra.mxu0 %v1491_v2  ;;  %1147 = vmatprep.mubr.bf16.mxu0 %v1380_v19 }
  0x24   :  { %1181 = vmatprep.subr.bf16.mxu0 %v1434_v1  ;;  %1200 = vmatpush3.bf16.msra.mxu1 %v1491_v2 }
  0x25   :  { %1201 = vmatprep.subr.bf16.mxu1 %v1434_v1  ;;  %1215 = vmatprep.mubr.msk.bf16.mxu1 %vm1435_vm0, %v1434_v1 }
  0x27   :  { %1182 = vmatpush3.bf16.msra.mxu0 %v1500_v4 }
  0x28   :  { %1183 = vmatprep.subr.bf16.mxu0 %v1434_v1  ;;  %1202 = vmatpush3.bf16.msra.mxu1 %v1500_v4 }
  0x29   :  { %1203 = vmatprep.subr.bf16.mxu1 %v1434_v1 }
  0x2a   :  { %1148 = vmatmul.mubr.bf16.gmra.mrb[4].mxu0 %v1381_v21 }
  0x2b   :  { %1184 = vmatpush3.bf16.msra.mxu0 %v1510_v6  ;;  %1151 = vmatprep.mubr.bf16.mxu0 %v1382_v22 }
  0x2c   :  { %1185 = vmatprep.subr.bf16.mxu0 %v1434_v1  ;;  %1204 = vmatpush3.bf16.msra.mxu1 %v1510_v6 }
  0x2d   :  { %1205 = vmatprep.subr.bf16.mxu1 %v1434_v1 }
  0x2f   :  { %1186 = vmatpush3.bf16.msra.mxu0 %v1520_v8 }
  0x30   :  { %1187 = vmatprep.subr.bf16.mxu0 %v1434_v1  ;;  %1206 = vmatpush3.bf16.msra.mxu1 %v1520_v8 }
  0x31   :  { %1207 = vmatprep.subr.bf16.mxu1 %v1434_v1 }
  0x32   :  { %1152 = vmatmul.mubr.bf16.gmra.mrb[8].mxu0 %v1383_v23 }
  0x33   :  { %1188 = vmatpush3.bf16.msra.mxu0 %v1529_v10  ;;  %1155 = vmatprep.mubr.bf16.mxu0 %v1384_v24 }
  0x34   :  { %1189 = vmatprep.subr.bf16.mxu0 %v1434_v1  ;;  %1208 = vmatpush3.bf16.msra.mxu1 %v1529_v10 }
  0x35   :  { %1209 = vmatprep.subr.bf16.mxu1 %v1434_v1 }
  0x37   :  { %1190 = vmatpush3.bf16.msra.mxu0 %v1542_v13 }
  0x38   :  { %1191 = vmatprep.subr.bf16.mxu0 %v1434_v1  ;;  %1210 = vmatpush3.bf16.msra.mxu1 %v1542_v13 }
  0x39   :  { %1211 = vmatprep.subr.bf16.mxu1 %v1434_v1 }
  0x3a   :  { %1156 = vmatmul.mubr.bf16.gmra.mrb[12].mxu0 %v1385_v25 }
  0x3b   :  { %1192 = vmatpush3.bf16.msra.mxu0 %v1553_v15  ;;  %1195 = vmatprep.mubr.msk.bf16.mxu0 %vm1435_vm0, %v1434_v1 }
  0x3c   :  { %1193 = vmatprep.subr.bf16.mxu0 %v1434_v1  ;;  %1212 = vmatpush3.bf16.msra.mxu1 %v1553_v15 }
  0x3d   :  { %1213 = vmatprep.subr.bf16.mxu1 %v1434_v1 }
  0x3f   :  { %1194 = vmatpush3.bf16.msra.mxu0 %v1563_v17 }
  0x40   :  { %1214 = vmatpush3.bf16.msra.mxu1 %v1563_v17  ;;  %1219 = vmatprep.subr.bf16.mxu0 %v1434_v1 }
  0x41   :  { %1239 = vmatprep.subr.bf16.mxu1 %v1434_v1 }
  0xf5   :  { %v1145_v27 = vpop.f32.mrb[0].mxu0  ;;  %v387_v28 = vpop.f32.mrb[0].mxu1 }
  0xf6   :  { %v205_v29 = vpop.f32.mrb[1].mxu0  ;;  %v1177_v30 = vpop.f32.mrb[1].mxu1  ;;  %v214_v54 = vadd.f32 %v1145_v27, %v1629_v26 }
  0xf7   :  { %v206_v31 = vadd.f32 %v1629_v26, %v205_v29  ;;  %v1146_v32 = vpop.f32.mrb[2].mxu0  ;;  %v390_v33 = vpop.f32.mrb[2].mxu1 }
  0xf8   :  { %v208_v34 = vpop.f32.mrb[3].mxu0  ;;  %v1178_v35 = vpop.f32.mrb[3].mxu1  ;;  %v217_v56 = vadd.f32 %v1146_v32, %v1629_v26 }
  0xf9   :  { %v394_v36 = vadd.f32 %v387_v28, %v206_v31  ;;  %v209_v37 = vadd.f32 %v1629_v26, %v208_v34 }
  0xfb   :  { %v395_v38 = vadd.f32 %v390_v33, %v209_v37  ;;  %1402 = vtanh.f32 %v394_v36 }
  0xfd   :  { %1404 = vtanh.f32 %v395_v38  ;;  %v1633_v39 = vpop.f32.mrb[4].mxu0 }
  0xfe   :  { %v1635_v40 = vpop.f32.mrb[5].mxu0  ;;  %v230_v21 = vadd.f32 %v1633_v39, %v1629_v26 }
  0xff   :  { %v1637_v41 = vpop.f32.mrb[6].mxu0  ;;  %v222_v3 = vadd.f32 %v1629_v26, %v1635_v40 }
 0x100   :  { %v1639_v42 = vpop.f32.mrb[7].mxu0  ;;  %v233_v23 = vadd.f32 %v1637_v41, %v1629_v26 }
 0x101   :  { %v225_v7 = vadd.f32 %v1629_v26, %v1639_v42 }
 0x105   :  { %v1403_v43 = vpop.eup %1402  ;;  %v1659_v46 = vpop.f32.mrb[8].mxu0 }
 0x106   :  { %v1661_v47 = vpop.f32.mrb[9].mxu0 }
 0x107   :  { %v1405_v44 = vpop.eup %1404  ;;  %v1663_v48 = vpop.f32.mrb[10].mxu0  ;;  %v238_v33 = vadd.f32 %v1629_v26, %v1661_v47 }
 0x108   :  { %v401_v45 = vpack.c.bf16 %v1405_v44, %v1403_v43  ;;  %v1665_v49 = vpop.f32.mrb[11].mxu0 }
 0x109   :  { %v241_v35 = vadd.f32 %v1629_v26, %v1665_v49 }
 0x10a   :  { %1196 = vmatmul.mubr.bf16.vlgmr.msra.gmra.mrb[16].mxu0 %v401_v45 }
 0x10b   :  { %1220 = vmatpush3.bf16.msra.mxu0 %v1491_v2  ;;  %1235 = vmatprep.mubr.msk.bf16.mxu0 %vm1435_vm0, %v1434_v1 }
 0x10c   :  { %1221 = vmatprep.subr.bf16.mxu0 %v1434_v1 }
 0x10d   :  { %v1667_v50 = vpop.f32.mrb[12].mxu0 }
 0x10e   :  { %v1669_v51 = vpop.f32.mrb[13].mxu0 }
 0x10f   :  { %1222 = vmatpush3.bf16.msra.mxu0 %v1500_v4  ;;  %v1671_v52 = vpop.f32.mrb[14].mxu0 }
 0x110   :  { %1223 = vmatprep.subr.bf16.mxu0 %v1434_v1  ;;  %v1673_v53 = vpop.f32.mrb[15].mxu0 }
 0x113   :  { %1224 = vmatpush3.bf16.msra.mxu0 %v1510_v6 }
 0x114   :  { %1225 = vmatprep.subr.bf16.mxu0 %v1434_v1 }
 0x117   :  { %1226 = vmatpush3.bf16.msra.mxu0 %v1520_v8 }
 0x118   :  { %1227 = vmatprep.subr.bf16.mxu0 %v1434_v1 }
 0x11b   :  { %1228 = vmatpush3.bf16.msra.mxu0 %v1529_v10 }
 0x11c   :  { %1229 = vmatprep.subr.bf16.mxu0 %v1434_v1 }
 0x11f   :  { %1230 = vmatpush3.bf16.msra.mxu0 %v1542_v13 }
 0x120   :  { %1231 = vmatprep.subr.bf16.mxu0 %v1434_v1 }
 0x123   :  { %1232 = vmatpush3.bf16.msra.mxu0 %v1553_v15 }
 0x124   :  { %1233 = vmatprep.subr.bf16.mxu0 %v1434_v1 }
 0x127   :  { %1234 = vmatpush3.bf16.msra.mxu0 %v1563_v17 }
 0x128   :  { %1259 = vmatprep.subr.bf16.mxu0 %v1434_v1 }
 0x1dd   :  { %v436_v55 = vpop.f32.mrb[16].mxu0 }
 0x1de   :  { %v443_v57 = vadd.f32 %v436_v55, %v214_v54  ;;  %v1197_v58 = vpop.f32.mrb[17].mxu0  ;;  %v1389_v54 = vld [vmem:[%s1855_s4 + $0x18] sm:$0xff]   ;;  %v254_v55 = vadd.f32 %v1629_v26, %v1669_v51  ;;  %v1390_v51 = vld [vmem:[%s1855_s4 + $0x20] sm:$0xff]  }
 0x1df   :  { %v439_v59 = vpop.f32.mrb[18].mxu0 }
 0x1e0   :  { %v444_v60 = vadd.f32 %v439_v59, %v217_v56  ;;  %v1198_v61 = vpop.f32.mrb[19].mxu0  ;;  %1406 = vtanh.f32 %v443_v57  ;;  %v257_v57 = vadd.f32 %v1629_v26, %v1673_v53  ;;  %v1391_v53 = vld [vmem:[%s1855_s4 + $0x28] sm:$0xff]  }
 0x1e2   :  { %1408 = vtanh.f32 %v444_v60 }
 0x1ea   :  { %v1407_v62 = vpop.eup %1406 }
 0x1ec   :  { %v1409_v63 = vpop.eup %1408 }
 0x1ed   :  { %v450_v0 = vpack.c.bf16 %v1409_v63, %v1407_v62 }
 0x1ef   :  { %1216 = vmatmul.mubr.bf16.vlgmr.msra.gmra.mrb[4].mxu1 %v450_v0 }
 0x1f0   :  { %1240 = vmatpush3.bf16.msra.mxu1 %v1491_v2  ;;  %1255 = vmatprep.mubr.msk.bf16.mxu1 %vm1435_vm0, %v1434_v1 }
 0x1f1   :  { %1241 = vmatprep.subr.bf16.mxu1 %v1434_v1 }
 0x1f4   :  { %1242 = vmatpush3.bf16.msra.mxu1 %v1500_v4 }
 0x1f5   :  { %1243 = vmatprep.subr.bf16.mxu1 %v1434_v1 }
 0x1f8   :  { %1244 = vmatpush3.bf16.msra.mxu1 %v1510_v6 }
 0x1f9   :  { %1245 = vmatprep.subr.bf16.mxu1 %v1434_v1 }
 0x1fc   :  { %1246 = vmatpush3.bf16.msra.mxu1 %v1520_v8 }
 0x1fd   :  { %1247 = vmatprep.subr.bf16.mxu1 %v1434_v1 }
 0x200   :  { %1248 = vmatpush3.bf16.msra.mxu1 %v1529_v10 }
 0x201   :  { %1249 = vmatprep.subr.bf16.mxu1 %v1434_v1 }
 0x204   :  { %1250 = vmatpush3.bf16.msra.mxu1 %v1542_v13 }
 0x205   :  { %1251 = vmatprep.subr.bf16.mxu1 %v1434_v1 }
 0x208   :  { %1252 = vmatpush3.bf16.msra.mxu1 %v1553_v15 }
 0x209   :  { %1253 = vmatprep.subr.bf16.mxu1 %v1434_v1 }
 0x20c   :  { %1254 = vmatpush3.bf16.msra.mxu1 %v1563_v17 }
 0x20d   :  { %1279 = vmatprep.subr.bf16.mxu1 %v1434_v1 }
 0x2c2   :  { %v485_v5 = vpop.f32.mrb[4].mxu1 }
 0x2c3   :  { %v492_v9 = vadd.f32 %v485_v5, %v222_v3  ;;  %v1217_v11 = vpop.f32.mrb[5].mxu1  ;;  %v1392_v5 = vld [vmem:[%s1855_s4 + $0x30] sm:$0xff]  }
 0x2c4   :  { %v488_v12 = vpop.f32.mrb[6].mxu1  ;;  %v1395_v11 = vld [vmem:[%s1856_s6 + $0x8] sm:$0xff]  }
 0x2c5   :  { %v493_v14 = vadd.f32 %v488_v12, %v225_v7  ;;  %v1218_v16 = vpop.f32.mrb[7].mxu1  ;;  %1410 = vtanh.f32 %v492_v9  ;;  %v1393_v7 = vld [vmem:[%s1855_s4 + $0x38] sm:$0xff]   ;;  %v1394_v9 = vld [vmem:[%s1856_s6] sm:$0xff]   ;;  %v1396_v12 = vld [vmem:[%s1856_s6 + $0x10] sm:$0xff]  }
 0x2c6   :  { %v1398_v16 = vld [vmem:[%s1856_s6 + $0x20] sm:$0xff]  }
 0x2c7   :  { %1412 = vtanh.f32 %v493_v14  ;;  %v1397_v14 = vld [vmem:[%s1856_s6 + $0x18] sm:$0xff]  }
 0x2cf   :  { %v1411_v18 = vpop.eup %1410 }
 0x2d1   :  { %v1413_v19 = vpop.eup %1412 }
 0x2d2   :  { %v499_v20 = vpack.c.bf16 %v1413_v19, %v1411_v18  ;;  %v1399_v18 = vld [vmem:[%s1856_s6 + $0x28] sm:$0xff]   ;;  %v262_v19 = vadd.f32 %v1667_v50, %v1629_v26  ;;  %v1003_v50 = vld [vmem:[%s1857_s5] ss:$0 sm:$0xff] }
 0x2d4   :  { %1236 = vmatmul.mubr.bf16.vlgmr.msra.gmra.mrb[20].mxu0 %v499_v20 }
 0x2d5   :  { %1260 = vmatpush3.bf16.msra.mxu0 %v1491_v2  ;;  %1275 = vmatprep.mubr.msk.bf16.mxu0 %vm1435_vm0, %v1434_v1 }
 0x2d6   :  { %1261 = vmatprep.subr.bf16.mxu0 %v1434_v1 }
 0x2d9   :  { %1262 = vmatpush3.bf16.msra.mxu0 %v1500_v4 }
 0x2da   :  { %1263 = vmatprep.subr.bf16.mxu0 %v1434_v1 }
 0x2dd   :  { %1264 = vmatpush3.bf16.msra.mxu0 %v1510_v6 }
 0x2de   :  { %1265 = vmatprep.subr.bf16.mxu0 %v1434_v1 }
 0x2e1   :  { %1266 = vmatpush3.bf16.msra.mxu0 %v1520_v8 }
 0x2e2   :  { %1267 = vmatprep.subr.bf16.mxu0 %v1434_v1 }
 0x2e5   :  { %1268 = vmatpush3.bf16.msra.mxu0 %v1529_v10 }
 0x2e6   :  { %1269 = vmatprep.subr.bf16.mxu0 %v1434_v1 }
 0x2e9   :  { %1270 = vmatpush3.bf16.msra.mxu0 %v1542_v13 }
 0x2ea   :  { %1271 = vmatprep.subr.bf16.mxu0 %v1434_v1 }
 0x2ed   :  { %1272 = vmatpush3.bf16.msra.mxu0 %v1553_v15 }
 0x2ee   :  { %1273 = vmatprep.subr.bf16.mxu0 %v1434_v1 }
 0x2f1   :  { %1274 = vmatpush3.bf16.msra.mxu0 %v1563_v17 }
 0x2f2   :  { %1299 = vmatprep.subr.bf16.mxu0 %v1434_v1 }
 0x3a7   :  { %v534_v22 = vpop.f32.mrb[20].mxu0 }
 0x3a8   :  { %v541_v24 = vadd.f32 %v534_v22, %v230_v21  ;;  %v1237_v25 = vpop.f32.mrb[21].mxu0  ;;  %v265_v21 = vadd.f32 %v1671_v52, %v1629_v26 }
 0x3a9   :  { %v537_v27 = vpop.f32.mrb[22].mxu0 }
 0x3aa   :  { %v542_v28 = vadd.f32 %v537_v27, %v233_v23  ;;  %v1238_v29 = vpop.f32.mrb[23].mxu0  ;;  %1414 = vtanh.f32 %v541_v24 }
 0x3ac   :  { %1416 = vtanh.f32 %v542_v28 }
 0x3b4   :  { %v1415_v30 = vpop.eup %1414 }
 0x3b6   :  { %v1417_v31 = vpop.eup %1416 }
 0x3b7   :  { %v548_v32 = vpack.c.bf16 %v1417_v31, %v1415_v30  ;;  %v1400_v31 = vld [vmem:[%s1856_s6 + $0x30] sm:$0xff]  }
 0x3b9   :  { %1256 = vmatmul.mubr.bf16.vlgmr.msra.gmra.mrb[8].mxu1 %v548_v32 }
 0x3ba   :  { %1280 = vmatpush3.bf16.msra.mxu1 %v1491_v2  ;;  %1295 = vmatprep.mubr.msk.bf16.mxu1 %vm1435_vm0, %v1434_v1 }
 0x3bb   :  { %1281 = vmatprep.subr.bf16.mxu1 %v1434_v1 }
 0x3be   :  { %1282 = vmatpush3.bf16.msra.mxu1 %v1500_v4 }
 0x3bf   :  { %1283 = vmatprep.subr.bf16.mxu1 %v1434_v1 }
 0x3c2   :  { %1284 = vmatpush3.bf16.msra.mxu1 %v1510_v6 }
 0x3c3   :  { %1285 = vmatprep.subr.bf16.mxu1 %v1434_v1 }
 0x3c6   :  { %1286 = vmatpush3.bf16.msra.mxu1 %v1520_v8 }
 0x3c7   :  { %1287 = vmatprep.subr.bf16.mxu1 %v1434_v1 }
 0x3ca   :  { %1288 = vmatpush3.bf16.msra.mxu1 %v1529_v10 }
 0x3cb   :  { %1289 = vmatprep.subr.bf16.mxu1 %v1434_v1 }
 0x3ce   :  { %1290 = vmatpush3.bf16.msra.mxu1 %v1542_v13 }
 0x3cf   :  { %1291 = vmatprep.subr.bf16.mxu1 %v1434_v1 }
 0x3d2   :  { %1292 = vmatpush3.bf16.msra.mxu1 %v1553_v15 }
 0x3d3   :  { %1293 = vmatprep.subr.bf16.mxu1 %v1434_v1 }
 0x3d6   :  { %1294 = vmatpush3.bf16.msra.mxu1 %v1563_v17 }
 0x3d7   :  { %1319 = vmatprep.subr.bf16.mxu1 %v1434_v1 }
 0x48c   :  { %v583_v34 = vpop.f32.mrb[8].mxu1 }
 0x48d   :  { %v590_v36 = vadd.f32 %v583_v34, %v238_v33  ;;  %v1257_v37 = vpop.f32.mrb[9].mxu1 }
 0x48e   :  { %v586_v38 = vpop.f32.mrb[10].mxu1 }
 0x48f   :  { %v591_v39 = vadd.f32 %v586_v38, %v241_v35  ;;  %v1258_v40 = vpop.f32.mrb[11].mxu1  ;;  %1418 = vtanh.f32 %v590_v36 }
 0x491   :  { %1420 = vtanh.f32 %v591_v39 }
 0x499   :  { %v1419_v41 = vpop.eup %1418 }
 0x49b   :  { %v1421_v42 = vpop.eup %1420 }
 0x49c   :  { %v597_v43 = vpack.c.bf16 %v1421_v42, %v1419_v41 }
 0x49e   :  { %1276 = vmatmul.mubr.bf16.vlgmr.msra.gmra.mrb[24].mxu0 %v597_v43 }
 0x49f   :  { %1300 = vmatpush3.bf16.msra.mxu0 %v1491_v2  ;;  %1315 = vmatprep.mubr.msk.bf16.mxu0 %vm1435_vm0, %v1434_v1  ;;  %v246_v2 = vadd.f32 %v1659_v46, %v1629_v26  ;;  %v1387_v46 = vld [vmem:[%s1855_s4 + $0x8] sm:$0xff]  }
 0x4a0   :  { %1301 = vmatprep.subr.bf16.mxu0 %v1434_v1 }
 0x4a3   :  { %1302 = vmatpush3.bf16.msra.mxu0 %v1500_v4 }
 0x4a4   :  { %1303 = vmatprep.subr.bf16.mxu0 %v1434_v1 }
 0x4a7   :  { %1304 = vmatpush3.bf16.msra.mxu0 %v1510_v6  ;;  %v249_v6 = vadd.f32 %v1663_v48, %v1629_v26  ;;  %v1388_v48 = vld [vmem:[%s1855_s4 + $0x10] sm:$0xff]   ;;  %v1401_v26 = vld [vmem:[%s1856_s6 + $0x38] sm:$0xff]  }
 0x4a8   :  { %1305 = vmatprep.subr.bf16.mxu0 %v1434_v1 }
 0x4ab   :  { %1306 = vmatpush3.bf16.msra.mxu0 %v1520_v8 }
 0x4ac   :  { %1307 = vmatprep.subr.bf16.mxu0 %v1434_v1 }
 0x4af   :  { %1308 = vmatpush3.bf16.msra.mxu0 %v1529_v10 }
 0x4b0   :  { %1309 = vmatprep.subr.bf16.mxu0 %v1434_v1 }
 0x4b3   :  { %1310 = vmatpush3.bf16.msra.mxu0 %v1542_v13 }
 0x4b4   :  { %1311 = vmatprep.subr.bf16.mxu0 %v1434_v1 }
 0x4b7   :  { %1312 = vmatpush3.bf16.msra.mxu0 %v1553_v15 }
 0x4b8   :  { %1313 = vmatprep.subr.bf16.mxu0 %v1434_v1 }
 0x4bb   :  { %1314 = vmatpush3.bf16.msra.mxu0 %v1563_v17  ;;  %v1386_v17 = vld [vmem:[%s1855_s4] sm:$0xff]  }
 0x4bc   :  { %1339 = vmatprep.subr.bf16.mxu0 %v1434_v1 }
 0x571   :  { %v632_v4 = vpop.f32.mrb[24].mxu0 }
 0x572   :  { %v639_v8 = vadd.f32 %v632_v4, %v246_v2  ;;  %v1277_v10 = vpop.f32.mrb[25].mxu0 }
 0x573   :  { %v635_v13 = vpop.f32.mrb[26].mxu0 }
 0x574   :  { %v640_v44 = vadd.f32 %v635_v13, %v249_v6  ;;  %v1278_v45 = vpop.f32.mrb[27].mxu0  ;;  %1422 = vtanh.f32 %v639_v8 }
 0x576   :  { %1424 = vtanh.f32 %v640_v44 }
 0x57e   :  { %v1423_v15 = vpop.eup %1422 }
 0x580   :  { %v1425_v47 = vpop.eup %1424 }
 0x581   :  { %v646_v49 = vpack.c.bf16 %v1425_v47, %v1423_v15 }
 0x583   :  { %1296 = vmatmul.mubr.bf16.vlgmr.msra.gmra.mrb[12].mxu1 %v646_v49 }
 0x584   :  { %1335 = vmatprep.mubr.msk.bf16.mxu1 %vm1435_vm0, %v1434_v1  ;;  %1320 = vmatpush3.bf16.msra.mxu1 %v1386_v17 }
 0x585   :  { %1321 = vmatprep.subr.bf16.mxu1 %v1434_v1 }
 0x588   :  { %1322 = vmatpush3.bf16.msra.mxu1 %v1387_v46 }
 0x589   :  { %1323 = vmatprep.subr.bf16.mxu1 %v1434_v1 }
 0x58c   :  { %1324 = vmatpush3.bf16.msra.mxu1 %v1388_v48 }
 0x58d   :  { %1325 = vmatprep.subr.bf16.mxu1 %v1434_v1 }
 0x590   :  { %1326 = vmatpush3.bf16.msra.mxu1 %v1389_v54 }
 0x591   :  { %1327 = vmatprep.subr.bf16.mxu1 %v1434_v1 }
 0x594   :  { %1328 = vmatpush3.bf16.msra.mxu1 %v1390_v51 }
 0x595   :  { %1329 = vmatprep.subr.bf16.mxu1 %v1434_v1 }
 0x598   :  { %1330 = vmatpush3.bf16.msra.mxu1 %v1391_v53 }
 0x599   :  { %1331 = vmatprep.subr.bf16.mxu1 %v1434_v1 }
 0x59c   :  { %1332 = vmatpush3.bf16.msra.mxu1 %v1392_v5 }
 0x59d   :  { %1333 = vmatprep.subr.bf16.mxu1 %v1434_v1 }
 0x5a0   :  { %1334 = vmatpush3.bf16.msra.mxu1 %v1393_v7 }
 0x656   :  { %v681_v56 = vpop.f32.mrb[12].mxu1 }
 0x657   :  { %v688_v58 = vadd.f32 %v681_v56, %v254_v55  ;;  %v1297_v59 = vpop.f32.mrb[13].mxu1 }
 0x658   :  { %v684_v60 = vpop.f32.mrb[14].mxu1 }
 0x659   :  { %v689_v61 = vadd.f32 %v684_v60, %v257_v57  ;;  %v1298_v62 = vpop.f32.mrb[15].mxu1  ;;  %1426 = vtanh.f32 %v688_v58 }
 0x65b   :  { %1428 = vtanh.f32 %v689_v61 }
 0x663   :  { %v1427_v63 = vpop.eup %1426 }
 0x665   :  { %v1429_v0 = vpop.eup %1428 }
 0x666   :  { %v695_v3 = vpack.c.bf16 %v1429_v0, %v1427_v63 }
 0x668   :  { %1316 = vmatmul.mubr.bf16.vlgmr.msra.gmra.mrb[28].mxu0 %v695_v3 }
 0x669   :  { %1355 = vmatprep.mubr.msk.bf16.mxu0 %vm1435_vm0, %v1434_v1  ;;  %1340 = vmatpush3.bf16.msra.mxu0 %v1394_v9 }
 0x66a   :  { %1341 = vmatprep.subr.bf16.mxu0 %v1434_v1 }
 0x66d   :  { %1342 = vmatpush3.bf16.msra.mxu0 %v1395_v11 }
 0x66e   :  { %1343 = vmatprep.subr.bf16.mxu0 %v1434_v1 }
 0x671   :  { %1344 = vmatpush3.bf16.msra.mxu0 %v1396_v12 }
 0x672   :  { %1345 = vmatprep.subr.bf16.mxu0 %v1434_v1 }
 0x675   :  { %1346 = vmatpush3.bf16.msra.mxu0 %v1397_v14 }
 0x676   :  { %1347 = vmatprep.subr.bf16.mxu0 %v1434_v1 }
 0x679   :  { %1348 = vmatpush3.bf16.msra.mxu0 %v1398_v16 }
 0x67a   :  { %1349 = vmatprep.subr.bf16.mxu0 %v1434_v1 }
 0x67d   :  { %1350 = vmatpush3.bf16.msra.mxu0 %v1399_v18 }
 0x67e   :  { %1351 = vmatprep.subr.bf16.mxu0 %v1434_v1 }
 0x681   :  { %1352 = vmatpush3.bf16.msra.mxu0 %v1400_v31 }
 0x682   :  { %1353 = vmatprep.subr.bf16.mxu0 %v1434_v1  ;;  %v1012_v1 = vld [vmem:[%s1858_s7] ss:$0 sm:$0xff] }
 0x685   :  { %1354 = vmatpush3.bf16.msra.mxu0 %v1401_v26 }
 0x73b   :  { %v730_v20 = vpop.f32.mrb[28].mxu0 }
 0x73c   :  { %v737_v22 = vadd.f32 %v730_v20, %v262_v19  ;;  %v1317_v23 = vpop.f32.mrb[29].mxu0 }
 0x73d   :  { %v733_v24 = vpop.f32.mrb[30].mxu0 }
 0x73e   :  { %v738_v25 = vadd.f32 %v733_v24, %v265_v21  ;;  %v1318_v27 = vpop.f32.mrb[31].mxu0  ;;  %1430 = vtanh.f32 %v737_v22 }
 0x740   :  { %1432 = vtanh.f32 %v738_v25 }
 0x748   :  { %v1431_v28 = vpop.eup %1430 }
 0x74a   :  { %v1433_v29 = vpop.eup %1432 }
 0x74b   :  { %v746_v30 = vpack.c.bf16 %v1433_v29, %v1431_v28 }
 0x74d   :  { %1336 = vmatmul.mubr.bf16.vlgmr.msra.gmra.mrb[16].mxu1 %v746_v30 }
 0x820   :  { %v852_v52 = vpop.f32.mrb[16].mxu1 }
 0x821   :  { %v1337_v32 = vpop.f32.mrb[17].mxu1  ;;  %v853_v34 = vadd.f32 %v1003_v50, %v852_v52 }
 0x822   :  { %v855_v33 = vpop.f32.mrb[18].mxu1 }
 0x823   :  { %v856_v35 = vadd.f32 %v1003_v50, %v855_v33  ;;  %v1338_v36 = vpop.f32.mrb[19].mxu1 }
 0x825   :  { %v859_v37 = vpack.c.bf16 %v856_v35, %v853_v34 }
 0x827   :  { %1356 = vmatmul.mubr.bf16.vlgmr.msra.gmra.mrb[32].mxu0 %v859_v37 }
 0x8fa   :  { %v965_v38 = vpop.f32.mrb[32].mxu0 }
 0x8fb   :  { %v966_v39 = vadd.f32 %v1012_v1, %v965_v38  ;;  %v1357_v40 = vpop.f32.mrb[33].mxu0 }
 0x8fc   :  { %v968_v41 = vpop.f32.mrb[34].mxu0 }
 0x8fd   :  { %972 = vst [vmem:[%s1859_s8] sm:$0xff] %v966_v39  ;;  %v969_v42 = vadd.f32 %v1012_v1, %v968_v41  ;;  %v1358_v43 = vpop.f32.mrb[35].mxu0 }
 0x8ff   :  { %973 = vst [vmem:[%s1859_s8 + $0x8] sm:$0xff] %v969_v42 }

</bundles_post_ra>
